<compile_context>
chip_gen: v6e
topology: v6e:2x2x1
jax: 0.10.0
libtpu: 0.0.40
codegen_flags: <defaults>
</compile_context>

<pallas_src>
import jax
import jax.numpy as jnp
from jax.experimental import pallas as pl
from jax.experimental.pallas import tpu as pltpu

# ----------------------------- configuration ------------------------------
REP_DIM = 16
NUM_CHANNELS = 2
_INNER_MLP_MULT = 2
HID = REP_DIM * _INNER_MLP_MULT          # 32  (hidden width of both MLPs)
SLAB_W = 32                              # lane width of the packed slabs

# synthetic "branched 6-cycle" subgraph types: 6-ring + 1 branch, 6-ring + 2 branches
BR_CYCLE_SIZES = [7, 8]
INSTANCES_PER_TYPE = [2, 2]
NUM_EDGES = 12

# rows of the f32 vector slab
V_BSEL0, V_BSEL1 = 0, 1                  # c1b + ab{0,1} @ c1wa  (per-type layer-1 bias)
V_C1G, V_C1BT = 2, 3
V_C2B, V_C2G, V_C2BT = 4, 5, 6
V_C3B = 7
V_E1B, V_E1G, V_E1BT = 8, 9, 10
V_E2B = 11
VEC_ROWS = 16                            # padded to a sublane-aligned row count


# ------------------------------ fused kernel -------------------------------
def make_forward(offsets, n0, n_edges, n_cycle, mat_rows):
    """Build the single-call fused forward. `offsets`, `n0` etc. are static."""
    f32 = jnp.float32
    bf16 = jnp.bfloat16

    def kernel(edge_ref, brc_ref, mat_ref, vec_ref, edge_out_ref, brc_out_ref):
        def mat(name):
            r, nr, nc = offsets[name]        # static slice -> cheap view/load
            return mat_ref[r:r + nr, 0:nc]

        def vec(i, width=SLAB_W):
            return vec_ref[i:i + 1, 0:width]

        def mm(a, b):                        # bf16 MXU matmul, f32 accumulate
            return jnp.dot(a.astype(bf16), b, preferred_element_type=f32)

        def bn_relu(x, g, bt):
            # fused BatchNorm1d (batch stats, eps=1e-5, centered variance) + ReLU
            mean = jnp.mean(x, axis=0, keepdims=True)
            d = x - mean
            var = jnp.mean(d * d, axis=0, keepdims=True)
            return jnp.maximum(d * (g * jax.lax.rsqrt(var + 1e-5)) + bt, 0.0)

        edge = edge_ref[...]                                    # [E, 16] f32
        brc = brc_ref[...]                                      # [N, 16] f32
        edge_bf = edge.astype(bf16)

        # edge -> branched-cycle gathers.  A0/A1 carry the subgraph-type masks
        # (folded host-side), BA = blk_adj @ e2c_adj; all three depend only on
        # `edge`, so the MXU pushes can overlap.
        g0 = jnp.dot(mat("a0"), edge_bf, preferred_element_type=f32)   # [N, 16]
        g1 = jnp.dot(mat("a1"), edge_bf, preferred_element_type=f32)   # [N, 16]
        blk = jnp.dot(mat("ba"), edge_bf, preferred_element_type=f32)  # [N, 16]

        # per-row Autobahn bias (already pushed through c1wa host-side):
        # rows < n0 are subgraph type 0, the rest type 1 (rows are stacked by type).
        row = jax.lax.broadcasted_iota(jnp.int32, (n_cycle, 1), 0)
        bias1 = jnp.where(row < n0, vec(V_BSEL0), vec(V_BSEL1))        # [N, 32]

        # br_cycle MLP layer 1 on the implicit concat [brc | e2c | blk | aut]:
        # the e2c and Autobahn contributions are folded into Wg0/Wg1 host-side.
        y = (mm(brc, mat("c1wr"))
             + mm(blk, mat("c1wb"))
             + mm(g0, mat("wg0"))
             + mm(g1, mat("wg1"))
             + bias1)
        h1 = bn_relu(y, vec(V_C1G), vec(V_C1BT))
        h2 = bn_relu(mm(h1, mat("c2w")) + vec(V_C2B), vec(V_C2G), vec(V_C2BT))
        brc_out = mm(h2, mat("c3w")) + vec(V_C3B, REP_DIM)             # [N, 16]
        brc_out_ref[...] = brc_out

        # gather_from_ptensors(br_cycle_out, G, edge, min_overlaps=2): 1st->0th = sum
        c2e = jnp.dot(mat("c2e"), brc_out.astype(bf16),
                      preferred_element_type=f32)                      # [E, 16]

        # edge MLP on the implicit concat [edge | c2e]
        z = (jnp.dot(edge_bf, mat("e1wr"), preferred_element_type=f32)
             + mm(c2e, mat("e1wc"))
             + vec(V_E1B))
        z = bn_relu(z, vec(V_E1G), vec(V_E1BT))
        edge_out_ref[...] = mm(z, mat("e2w")) + vec(V_E2B, REP_DIM)    # [E, 16]

    # advisory cost estimate so XLA schedules neighbours around this tiny call
    macs = (3 * n_cycle * n_edges * REP_DIM          # g0 / g1 / blk gathers
            + 4 * n_cycle * REP_DIM * HID            # layer-1 terms
            + n_cycle * HID * HID                    # layer 2
            + n_cycle * HID * REP_DIM                # layer 3
            + n_edges * n_cycle * REP_DIM            # cycle -> edge gather
            + 2 * n_edges * REP_DIM * HID            # edge layer 1
            + n_edges * HID * REP_DIM)               # edge layer 2
    bytes_accessed = (n_edges * REP_DIM * 4 + n_cycle * REP_DIM * 4
                      + mat_rows * SLAB_W * 2 + VEC_ROWS * SLAB_W * 4
                      + (n_edges + n_cycle) * REP_DIM * 4)
    cost = pl.CostEstimate(flops=2 * macs, transcendentals=3 * HID,
                           bytes_accessed=bytes_accessed)

    vspec = pl.BlockSpec(memory_space=pltpu.MemorySpace.VMEM)

    @jax.jit
    def forward(edge_rep, br_cycle_rep, mat_slab, vec_slab):
        return pl.pallas_call(
            kernel,
            out_shape=(
                jax.ShapeDtypeStruct((n_edges, REP_DIM), jnp.float32),
                jax.ShapeDtypeStruct((n_cycle, REP_DIM), jnp.float32),
            ),
            in_specs=[vspec, vspec, vspec, vspec],
            out_specs=(vspec, vspec),
            cost_estimate=cost,
        )(edge_rep, br_cycle_rep, mat_slab, vec_slab)

    return forward


# ------------------------------ parameter setup ----------------------------
def _init_linear(key, fan_in, fan_out):
    kw, kb = jax.random.split(key)
    bound = 1.0 / jnp.sqrt(jnp.float32(fan_in))
    w = jax.random.uniform(kw, (fan_in, fan_out), jnp.float32, -bound, bound)
    b = jax.random.uniform(kb, (1, fan_out), jnp.float32, -bound, bound)
    return w, b


def init_mlp(key, in_dim, hidden_dim, out_dim, n_layers):
    # TODO(synk): exact `get_mlp` composition is not in the reference; assumed
    # n_layers Linear layers with BatchNorm1d+ReLU after every hidden layer.
    dims = [in_dim] + [hidden_dim] * (n_layers - 1) + [out_dim]
    keys = jax.random.split(key, n_layers)
    layers = []
    for i in range(n_layers):
        w, b = _init_linear(keys[i], dims[i], dims[i + 1])
        if i < n_layers - 1:
            layers.append((w, b, jnp.ones((1, dims[i + 1]), jnp.float32),
                           jnp.zeros((1, dims[i + 1]), jnp.float32)))
        else:
            layers.append((w, b))
    return layers


def init_params(key):
    k_br, k_edge, k_aut = jax.random.split(key, 3)
    return {
        "br_cycle_mlp": init_mlp(
            k_br, (3 + NUM_CHANNELS) * REP_DIM, REP_DIM * _INNER_MLP_MULT, REP_DIM, 3),
        "edge_mlp": init_mlp(
            k_edge, 2 * REP_DIM, REP_DIM * _INNER_MLP_MULT, REP_DIM, 2),
        # Autobahn(rep_dim, rep_dim*num_channels, br_cycle) per branched-cycle type
        "autobahn": [
            _init_linear(k, REP_DIM, REP_DIM * NUM_CHANNELS)
            for k in jax.random.split(k_aut, len(BR_CYCLE_SIZES))
        ],
    }


# ------------------------------ synthetic graph ----------------------------
def _shift_gather(n_rows, n_cols, shifts):
    rows = jnp.arange(n_rows)
    m = jnp.zeros((n_rows, n_cols), jnp.float32)
    for off in shifts:
        m = m.at[rows, (rows + off) % n_cols].set(1.0)
    return m


def _block_diag(blocks):
    rows = sum(b.shape[0] for b in blocks)
    cols = sum(b.shape[1] for b in blocks)
    out = jnp.zeros((rows, cols), jnp.float32)
    r = c = 0
    for b in blocks:
        out = out.at[r:r + b.shape[0], c:c + b.shape[1]].set(b)
        r += b.shape[0]
        c += b.shape[1]
    return out


def build_graph():
    # TODO(synk): real ptens gather maps come from subgraph isomorphism search on G;
    # here deterministic synthetic overlap matrices encode the same linear structure.
    n_rows = [s * i for s, i in zip(BR_CYCLE_SIZES, INSTANCES_PER_TYPE)]
    n_total = sum(n_rows)
    graph = {
        # 0th(edge) -> 1st(branched cycle) gather, min_overlaps=2: broadcast+sum
        "e2c": [_shift_gather(n, NUM_EDGES, (0, 3)) for n in n_rows],
        # 1st -> 1st gather with full overlap: second linmap component = block sum
        "blk": [
            jnp.kron(jnp.eye(inst, dtype=jnp.float32),
                     jnp.ones((size, size), jnp.float32))
            for size, inst in zip(BR_CYCLE_SIZES, INSTANCES_PER_TYPE)
        ],
        # 1st(branched cycle) -> 0th(edge) gather, min_overlaps=2: sum over overlap
        "c2e": _shift_gather(NUM_EDGES, n_total, (0, 5, 11)),
    }
    return graph, n_total


# --------------------------- host-side slab packing -------------------------
def _pad16(n):
    return (n + 15) // 16 * 16


def pack_params(graph, params):
    """Fold masks/biases, precompute BA, and pack everything into two slabs."""
    n_rows = [s * i for s, i in zip(BR_CYCLE_SIZES, INSTANCES_PER_TYPE)]
    n0, n_cycle = n_rows[0], sum(n_rows)

    e2c_adj = jnp.concatenate(graph["e2c"], axis=0)            # [N, E]
    blk_adj = _block_diag(graph["blk"])                        # [N, N]
    c2e_adj = graph["c2e"]                                     # [E, N]

    # fold subgraph-type masks into the adjacency (rows are stacked by type)
    m0 = (jnp.arange(n_cycle) < n0).astype(jnp.float32)[:, None]
    a0 = e2c_adj * m0
    a1 = e2c_adj * (1.0 - m0)
    ba = blk_adj @ e2c_adj                                     # [N, E] (small ints)

    (aw0, ab0), (aw1, ab1) = params["autobahn"]
    (c1w, c1b, c1g, c1bt), (c2w, c2b, c2g, c2bt), (c3w, c3b) = params["br_cycle_mlp"]
    # concat order in the forward: [br_cycle_rep | e2c | blk | aut]
    c1wr = c1w[0 * REP_DIM:1 * REP_DIM]
    c1we = c1w[1 * REP_DIM:2 * REP_DIM]
    c1wb = c1w[2 * REP_DIM:3 * REP_DIM]
    c1wa = c1w[3 * REP_DIM:]
    # fold the Autobahn linear map and bias through the layer-1 weight c1wa
    wg0 = c1we + aw0 @ c1wa                                    # [16, 32]
    wg1 = c1we + aw1 @ c1wa
    bsel0 = c1b + ab0 @ c1wa                                   # [1, 32]
    bsel1 = c1b + ab1 @ c1wa

    (e1w, e1b, e1g, e1bt), (e2w, e2b) = params["edge_mlp"]
    e1wr = e1w[:REP_DIM]
    e1wc = e1w[REP_DIM:]

    # ---- bf16 matrix slab (adjacency + weights), 16-row-aligned segments ----
    pieces = [("a0", a0), ("a1", a1), ("ba", ba), ("c2e", c2e_adj),
              ("c1wr", c1wr), ("c1wb", c1wb), ("wg0", wg0), ("wg1", wg1),
              ("c2w", c2w), ("c3w", c3w),
              ("e1wr", e1wr), ("e1wc", e1wc), ("e2w", e2w)]
    offsets, blocks, r = {}, [], 0
    for name, arr in pieces:
        nr, nc = arr.shape
        pr = _pad16(nr)
        blocks.append(jnp.zeros((pr, SLAB_W), jnp.float32).at[:nr, :nc].set(arr))
        offsets[name] = (r, nr, nc)
        r += pr
    mat_slab = jnp.concatenate(blocks, axis=0).astype(jnp.bfloat16)

    # ---- f32 vector slab (biases / BN params) ----
    vec_rows = [bsel0, bsel1, c1g, c1bt, c2b, c2g, c2bt, c3b, e1b, e1g, e1bt, e2b]
    vec_slab = jnp.zeros((VEC_ROWS, SLAB_W), jnp.float32)
    for i, v in enumerate(vec_rows):
        vec_slab = vec_slab.at[i:i + 1, :v.shape[1]].set(v)

    return mat_slab, vec_slab, offsets, n0, n_cycle


# ---------------------- pure-JAX reference (unfused, f32) -------------------
def reference_forward(edge_rep, br_cycle_rep, graph, params):
    def apply_mlp(layers, x):
        for layer in layers[:-1]:
            w, b, g, bt = layer
            y = x @ w + b
            mean = jnp.mean(y, axis=0, keepdims=True)
            var = jnp.mean(jnp.square(y - mean), axis=0, keepdims=True)
            y = (y - mean) * jax.lax.rsqrt(var + 1e-5)
            x = jnp.maximum(y * g + bt, 0.0)
        w, b = layers[-1]
        return x @ w + b

    aut_list, linmap_list = [], []
    for t in range(len(graph["e2c"])):
        e2c = graph["e2c"][t] @ edge_rep
        aw, ab = params["autobahn"][t]
        aut_list.append(e2c @ aw + ab)
        blk = graph["blk"][t] @ e2c
        linmap_list.append(jnp.concatenate([e2c, blk], axis=-1))
    aut = jnp.concatenate(aut_list, axis=0)
    linmap = jnp.concatenate(linmap_list, axis=0)
    brc_in = jnp.concatenate([br_cycle_rep, linmap, aut], axis=-1)
    brc_out = apply_mlp(params["br_cycle_mlp"], brc_in)
    c2e = graph["c2e"] @ brc_out
    edge_out = apply_mlp(params["edge_mlp"],
                         jnp.concatenate([edge_rep, c2e], axis=-1))
    return edge_out, brc_out


# ----------------------------------- main -----------------------------------
if __name__ == "__main__":
    key = jax.random.PRNGKey(0)
    k_edge, k_cycle, k_param = jax.random.split(key, 3)

    graph, n_total = build_graph()
    params = init_params(k_param)
    mat_slab, vec_slab, offsets, n0, n_cycle = pack_params(graph, params)

    edge_rep = jax.random.normal(k_edge, (NUM_EDGES, REP_DIM), jnp.float32)
    br_cycle_rep = jax.random.normal(k_cycle, (n_cycle, REP_DIM), jnp.float32)

    fwd = make_forward(offsets, n0, NUM_EDGES, n_cycle, mat_slab.shape[0])
    edge_out, br_cycle_out = fwd(edge_rep, br_cycle_rep, mat_slab, vec_slab)
    jax.block_until_ready((edge_out, br_cycle_out))

    ref_edge, ref_cycle = reference_forward(edge_rep, br_cycle_rep, graph, params)

    assert edge_out.shape == (NUM_EDGES, REP_DIM)
    assert br_cycle_out.shape == (n_cycle, REP_DIM)
    assert bool(jnp.all(jnp.isfinite(edge_out)))
    assert bool(jnp.all(jnp.isfinite(br_cycle_out)))
    # bf16 MXU inputs (f32 accumulate / BN) -> slightly looser tolerance vs f32 ref
    assert jnp.allclose(edge_out, ref_edge, rtol=5e-2, atol=5e-2)
    assert jnp.allclose(br_cycle_out, ref_cycle, rtol=5e-2, atol=5e-2)
    print("KERNEL_OK")
</pallas_src>

<mosaic_0001>
module attributes {stable_mosaic.version = 11 : i64} {
  func.func @kernel(%arg0: memref<12x16xf32, #tpu.memory_space<vmem>>, %arg1: memref<30x16xf32, #tpu.memory_space<vmem>>, %arg2: memref<304x32xbf16, #tpu.memory_space<vmem>>, %arg3: memref<16x32xf32, #tpu.memory_space<vmem>>, %arg4: memref<12x16xf32, #tpu.memory_space<vmem>>, %arg5: memref<30x16xf32, #tpu.memory_space<vmem>>) attributes {dimension_semantics = [], scalar_prefetch = 0 : i64, scratch_operands = 0 : i64, tpu.core_type = #tpu.core_type<tc>} {
    %c0 = arith.constant 0 : index
    %c0_0 = arith.constant 0 : index
    %0 = vector.load %arg0[%c0, %c0_0] : memref<12x16xf32, #tpu.memory_space<vmem>>, vector<12x16xf32>
    %c0_1 = arith.constant 0 : index
    %c0_2 = arith.constant 0 : index
    %1 = vector.load %arg1[%c0_1, %c0_2] : memref<30x16xf32, #tpu.memory_space<vmem>>, vector<30x16xf32>
    %2 = arith.truncf %0 : vector<12x16xf32> to vector<12x16xbf16>
    %c0_3 = arith.constant 0 : index
    %c0_4 = arith.constant 0 : index
    %3 = vector.load %arg2[%c0_3, %c0_4] : memref<304x32xbf16, #tpu.memory_space<vmem>>, vector<30x12xbf16>
    %cst = arith.constant dense<0.000000e+00> : vector<30x16xf32>
    %4 = tpu.matmul %3, %2, %cst {dimension_numbers = #tpu.dot_dimension_numbers<[1], [0], [0], [1], [0, 0, 1, 1], [], []>} : vector<30x12xbf16>, vector<12x16xbf16>, vector<30x16xf32> -> vector<30x16xf32>
    %c32 = arith.constant 32 : index
    %c0_5 = arith.constant 0 : index
    %5 = vector.load %arg2[%c32, %c0_5] : memref<304x32xbf16, #tpu.memory_space<vmem>>, vector<30x12xbf16>
    %cst_6 = arith.constant dense<0.000000e+00> : vector<30x16xf32>
    %6 = tpu.matmul %5, %2, %cst_6 {dimension_numbers = #tpu.dot_dimension_numbers<[1], [0], [0], [1], [0, 0, 1, 1], [], []>} : vector<30x12xbf16>, vector<12x16xbf16>, vector<30x16xf32> -> vector<30x16xf32>
    %c64 = arith.constant 64 : index
    %c0_7 = arith.constant 0 : index
    %7 = vector.load %arg2[%c64, %c0_7] : memref<304x32xbf16, #tpu.memory_space<vmem>>, vector<30x12xbf16>
    %cst_8 = arith.constant dense<0.000000e+00> : vector<30x16xf32>
    %8 = tpu.matmul %7, %2, %cst_8 {dimension_numbers = #tpu.dot_dimension_numbers<[1], [0], [0], [1], [0, 0, 1, 1], [], []>} : vector<30x12xbf16>, vector<12x16xbf16>, vector<30x16xf32> -> vector<30x16xf32>
    %9 = tpu.iota {dimensions = array<i32: 0>} : vector<30x1xi32>
    %c14_i32 = arith.constant 14 : i32
    %10 = vector.broadcast %c14_i32 : i32 to vector<30x1xi32>
    %11 = arith.cmpi slt, %9, %10 : vector<30x1xi32>
    %c0_9 = arith.constant 0 : index
    %c0_10 = arith.constant 0 : index
    %12 = vector.load %arg3[%c0_9, %c0_10] : memref<16x32xf32, #tpu.memory_space<vmem>>, vector<1x32xf32>
    %c1 = arith.constant 1 : index
    %c0_11 = arith.constant 0 : index
    %13 = vector.load %arg3[%c1, %c0_11] : memref<16x32xf32, #tpu.memory_space<vmem>>, vector<1x32xf32>
    %14 = vector.shape_cast %11 : vector<30x1xi1> to vector<30x1xi1>
    %15 = vector.broadcast %14 : vector<30x1xi1> to vector<30x32xi1>
    %16 = vector.shape_cast %12 : vector<1x32xf32> to vector<1x32xf32>
    %17 = vector.broadcast %16 : vector<1x32xf32> to vector<30x32xf32>
    %18 = vector.shape_cast %13 : vector<1x32xf32> to vector<1x32xf32>
    %19 = vector.broadcast %18 : vector<1x32xf32> to vector<30x32xf32>
    %20 = arith.select %15, %17, %19 : vector<30x32xi1>, vector<30x32xf32>
    %c112 = arith.constant 112 : index
    %c0_12 = arith.constant 0 : index
    %21 = vector.load %arg2[%c112, %c0_12] : memref<304x32xbf16, #tpu.memory_space<vmem>>, vector<16x32xbf16>
    %22 = arith.truncf %1 : vector<30x16xf32> to vector<30x16xbf16>
    %cst_13 = arith.constant dense<0.000000e+00> : vector<30x32xf32>
    %23 = tpu.matmul %22, %21, %cst_13 {dimension_numbers = #tpu.dot_dimension_numbers<[1], [0], [0], [1], [0, 0, 1, 1], [], []>} : vector<30x16xbf16>, vector<16x32xbf16>, vector<30x32xf32> -> vector<30x32xf32>
    %c128 = arith.constant 128 : index
    %c0_14 = arith.constant 0 : index
    %24 = vector.load %arg2[%c128, %c0_14] : memref<304x32xbf16, #tpu.memory_space<vmem>>, vector<16x32xbf16>
    %25 = arith.truncf %8 : vector<30x16xf32> to vector<30x16xbf16>
    %cst_15 = arith.constant dense<0.000000e+00> : vector<30x32xf32>
    %26 = tpu.matmul %25, %24, %cst_15 {dimension_numbers = #tpu.dot_dimension_numbers<[1], [0], [0], [1], [0, 0, 1, 1], [], []>} : vector<30x16xbf16>, vector<16x32xbf16>, vector<30x32xf32> -> vector<30x32xf32>
    %27 = arith.addf %23, %26 : vector<30x32xf32>
    %c144 = arith.constant 144 : index
    %c0_16 = arith.constant 0 : index
    %28 = vector.load %arg2[%c144, %c0_16] : memref<304x32xbf16, #tpu.memory_space<vmem>>, vector<16x32xbf16>
    %29 = arith.truncf %4 : vector<30x16xf32> to vector<30x16xbf16>
    %cst_17 = arith.constant dense<0.000000e+00> : vector<30x32xf32>
    %30 = tpu.matmul %29, %28, %cst_17 {dimension_numbers = #tpu.dot_dimension_numbers<[1], [0], [0], [1], [0, 0, 1, 1], [], []>} : vector<30x16xbf16>, vector<16x32xbf16>, vector<30x32xf32> -> vector<30x32xf32>
    %31 = arith.addf %27, %30 : vector<30x32xf32>
    %c160 = arith.constant 160 : index
    %c0_18 = arith.constant 0 : index
    %32 = vector.load %arg2[%c160, %c0_18] : memref<304x32xbf16, #tpu.memory_space<vmem>>, vector<16x32xbf16>
    %33 = arith.truncf %6 : vector<30x16xf32> to vector<30x16xbf16>
    %cst_19 = arith.constant dense<0.000000e+00> : vector<30x32xf32>
    %34 = tpu.matmul %33, %32, %cst_19 {dimension_numbers = #tpu.dot_dimension_numbers<[1], [0], [0], [1], [0, 0, 1, 1], [], []>} : vector<30x16xbf16>, vector<16x32xbf16>, vector<30x32xf32> -> vector<30x32xf32>
    %35 = arith.addf %31, %34 : vector<30x32xf32>
    %36 = arith.addf %35, %20 : vector<30x32xf32>
    %c2 = arith.constant 2 : index
    %c0_20 = arith.constant 0 : index
    %37 = vector.load %arg3[%c2, %c0_20] : memref<16x32xf32, #tpu.memory_space<vmem>>, vector<1x32xf32>
    %c3 = arith.constant 3 : index
    %c0_21 = arith.constant 0 : index
    %38 = vector.load %arg3[%c3, %c0_21] : memref<16x32xf32, #tpu.memory_space<vmem>>, vector<1x32xf32>
    %cst_22 = arith.constant dense<0.000000e+00> : vector<32xf32>
    %39 = vector.multi_reduction <add>, %36, %cst_22 [0] : vector<30x32xf32> to vector<32xf32>
    %40 = vector.shape_cast %39 : vector<32xf32> to vector<1x32xf32>
    %cst_23 = arith.constant 3.000000e+01 : f32
    %41 = vector.broadcast %cst_23 : f32 to vector<1x32xf32>
    %42 = arith.divf %40, %41 : vector<1x32xf32>
    %43 = vector.broadcast %42 : vector<1x32xf32> to vector<30x32xf32>
    %44 = arith.subf %36, %43 : vector<30x32xf32>
    %45 = arith.mulf %44, %44 : vector<30x32xf32>
    %cst_24 = arith.constant dense<0.000000e+00> : vector<32xf32>
    %46 = vector.multi_reduction <add>, %45, %cst_24 [0] : vector<30x32xf32> to vector<32xf32>
    %47 = vector.shape_cast %46 : vector<32xf32> to vector<1x32xf32>
    %cst_25 = arith.constant 3.000000e+01 : f32
    %48 = vector.broadcast %cst_25 : f32 to vector<1x32xf32>
    %49 = arith.divf %47, %48 : vector<1x32xf32>
    %cst_26 = arith.constant 9.99999974E-6 : f32
    %50 = vector.broadcast %cst_26 : f32 to vector<1x32xf32>
    %51 = arith.addf %49, %50 : vector<1x32xf32>
    %52 = math.rsqrt %51 : vector<1x32xf32>
    %53 = arith.mulf %37, %52 : vector<1x32xf32>
    %54 = vector.broadcast %53 : vector<1x32xf32> to vector<30x32xf32>
    %55 = arith.mulf %44, %54 : vector<30x32xf32>
    %56 = vector.broadcast %38 : vector<1x32xf32> to vector<30x32xf32>
    %57 = arith.addf %55, %56 : vector<30x32xf32>
    %cst_27 = arith.constant 0.000000e+00 : f32
    %58 = vector.broadcast %cst_27 : f32 to vector<30x32xf32>
    %59 = arith.maximumf %57, %58 : vector<30x32xf32>
    %c176 = arith.constant 176 : index
    %c0_28 = arith.constant 0 : index
    %60 = vector.load %arg2[%c176, %c0_28] : memref<304x32xbf16, #tpu.memory_space<vmem>>, vector<32x32xbf16>
    %61 = arith.truncf %59 : vector<30x32xf32> to vector<30x32xbf16>
    %cst_29 = arith.constant dense<0.000000e+00> : vector<30x32xf32>
    %62 = tpu.matmul %61, %60, %cst_29 {dimension_numbers = #tpu.dot_dimension_numbers<[1], [0], [0], [1], [0, 0, 1, 1], [], []>} : vector<30x32xbf16>, vector<32x32xbf16>, vector<30x32xf32> -> vector<30x32xf32>
    %c4 = arith.constant 4 : index
    %c0_30 = arith.constant 0 : index
    %63 = vector.load %arg3[%c4, %c0_30] : memref<16x32xf32, #tpu.memory_space<vmem>>, vector<1x32xf32>
    %64 = vector.broadcast %63 : vector<1x32xf32> to vector<30x32xf32>
    %65 = arith.addf %62, %64 : vector<30x32xf32>
    %c5 = arith.constant 5 : index
    %c0_31 = arith.constant 0 : index
    %66 = vector.load %arg3[%c5, %c0_31] : memref<16x32xf32, #tpu.memory_space<vmem>>, vector<1x32xf32>
    %c6 = arith.constant 6 : index
    %c0_32 = arith.constant 0 : index
    %67 = vector.load %arg3[%c6, %c0_32] : memref<16x32xf32, #tpu.memory_space<vmem>>, vector<1x32xf32>
    %cst_33 = arith.constant dense<0.000000e+00> : vector<32xf32>
    %68 = vector.multi_reduction <add>, %65, %cst_33 [0] : vector<30x32xf32> to vector<32xf32>
    %69 = vector.shape_cast %68 : vector<32xf32> to vector<1x32xf32>
    %cst_34 = arith.constant 3.000000e+01 : f32
    %70 = vector.broadcast %cst_34 : f32 to vector<1x32xf32>
    %71 = arith.divf %69, %70 : vector<1x32xf32>
    %72 = vector.broadcast %71 : vector<1x32xf32> to vector<30x32xf32>
    %73 = arith.subf %65, %72 : vector<30x32xf32>
    %74 = arith.mulf %73, %73 : vector<30x32xf32>
    %cst_35 = arith.constant dense<0.000000e+00> : vector<32xf32>
    %75 = vector.multi_reduction <add>, %74, %cst_35 [0] : vector<30x32xf32> to vector<32xf32>
    %76 = vector.shape_cast %75 : vector<32xf32> to vector<1x32xf32>
    %cst_36 = arith.constant 3.000000e+01 : f32
    %77 = vector.broadcast %cst_36 : f32 to vector<1x32xf32>
    %78 = arith.divf %76, %77 : vector<1x32xf32>
    %cst_37 = arith.constant 9.99999974E-6 : f32
    %79 = vector.broadcast %cst_37 : f32 to vector<1x32xf32>
    %80 = arith.addf %78, %79 : vector<1x32xf32>
    %81 = math.rsqrt %80 : vector<1x32xf32>
    %82 = arith.mulf %66, %81 : vector<1x32xf32>
    %83 = vector.broadcast %82 : vector<1x32xf32> to vector<30x32xf32>
    %84 = arith.mulf %73, %83 : vector<30x32xf32>
    %85 = vector.broadcast %67 : vector<1x32xf32> to vector<30x32xf32>
    %86 = arith.addf %84, %85 : vector<30x32xf32>
    %cst_38 = arith.constant 0.000000e+00 : f32
    %87 = vector.broadcast %cst_38 : f32 to vector<30x32xf32>
    %88 = arith.maximumf %86, %87 : vector<30x32xf32>
    %c208 = arith.constant 208 : index
    %c0_39 = arith.constant 0 : index
    %89 = vector.load %arg2[%c208, %c0_39] : memref<304x32xbf16, #tpu.memory_space<vmem>>, vector<32x16xbf16>
    %90 = arith.truncf %88 : vector<30x32xf32> to vector<30x32xbf16>
    %cst_40 = arith.constant dense<0.000000e+00> : vector<30x16xf32>
    %91 = tpu.matmul %90, %89, %cst_40 {dimension_numbers = #tpu.dot_dimension_numbers<[1], [0], [0], [1], [0, 0, 1, 1], [], []>} : vector<30x32xbf16>, vector<32x16xbf16>, vector<30x16xf32> -> vector<30x16xf32>
    %c7 = arith.constant 7 : index
    %c0_41 = arith.constant 0 : index
    %92 = vector.load %arg3[%c7, %c0_41] : memref<16x32xf32, #tpu.memory_space<vmem>>, vector<1x16xf32>
    %93 = vector.broadcast %92 : vector<1x16xf32> to vector<30x16xf32>
    %94 = arith.addf %91, %93 : vector<30x16xf32>
    %c0_42 = arith.constant 0 : index
    %c0_43 = arith.constant 0 : index
    %95 = vector.load %arg5[%c0_42, %c0_43] : memref<30x16xf32, #tpu.memory_space<vmem>>, vector<30x16xf32>
    tpu.vector_store %arg5[%c0_42, %c0_43], %94 {strides = array<i32>} : memref<30x16xf32, #tpu.memory_space<vmem>>, vector<30x16xf32>,
    %c96 = arith.constant 96 : index
    %c0_44 = arith.constant 0 : index
    %96 = vector.load %arg2[%c96, %c0_44] : memref<304x32xbf16, #tpu.memory_space<vmem>>, vector<12x30xbf16>
    %97 = arith.truncf %94 : vector<30x16xf32> to vector<30x16xbf16>
    %cst_45 = arith.constant dense<0.000000e+00> : vector<12x16xf32>
    %98 = tpu.matmul %96, %97, %cst_45 {dimension_numbers = #tpu.dot_dimension_numbers<[1], [0], [0], [1], [0, 0, 1, 1], [], []>} : vector<12x30xbf16>, vector<30x16xbf16>, vector<12x16xf32> -> vector<12x16xf32>
    %c240 = arith.constant 240 : index
    %c0_46 = arith.constant 0 : index
    %99 = vector.load %arg2[%c240, %c0_46] : memref<304x32xbf16, #tpu.memory_space<vmem>>, vector<16x32xbf16>
    %cst_47 = arith.constant dense<0.000000e+00> : vector<12x32xf32>
    %100 = tpu.matmul %2, %99, %cst_47 {dimension_numbers = #tpu.dot_dimension_numbers<[1], [0], [0], [1], [0, 0, 1, 1], [], []>} : vector<12x16xbf16>, vector<16x32xbf16>, vector<12x32xf32> -> vector<12x32xf32>
    %c256 = arith.constant 256 : index
    %c0_48 = arith.constant 0 : index
    %101 = vector.load %arg2[%c256, %c0_48] : memref<304x32xbf16, #tpu.memory_space<vmem>>, vector<16x32xbf16>
    %102 = arith.truncf %98 : vector<12x16xf32> to vector<12x16xbf16>
    %cst_49 = arith.constant dense<0.000000e+00> : vector<12x32xf32>
    %103 = tpu.matmul %102, %101, %cst_49 {dimension_numbers = #tpu.dot_dimension_numbers<[1], [0], [0], [1], [0, 0, 1, 1], [], []>} : vector<12x16xbf16>, vector<16x32xbf16>, vector<12x32xf32> -> vector<12x32xf32>
    %104 = arith.addf %100, %103 : vector<12x32xf32>
    %c8 = arith.constant 8 : index
    %c0_50 = arith.constant 0 : index
    %105 = vector.load %arg3[%c8, %c0_50] : memref<16x32xf32, #tpu.memory_space<vmem>>, vector<1x32xf32>
    %106 = vector.broadcast %105 : vector<1x32xf32> to vector<12x32xf32>
    %107 = arith.addf %104, %106 : vector<12x32xf32>
    %c9 = arith.constant 9 : index
    %c0_51 = arith.constant 0 : index
    %108 = vector.load %arg3[%c9, %c0_51] : memref<16x32xf32, #tpu.memory_space<vmem>>, vector<1x32xf32>
    %c10 = arith.constant 10 : index
    %c0_52 = arith.constant 0 : index
    %109 = vector.load %arg3[%c10, %c0_52] : memref<16x32xf32, #tpu.memory_space<vmem>>, vector<1x32xf32>
    %cst_53 = arith.constant dense<0.000000e+00> : vector<32xf32>
    %110 = vector.multi_reduction <add>, %107, %cst_53 [0] : vector<12x32xf32> to vector<32xf32>
    %111 = vector.shape_cast %110 : vector<32xf32> to vector<1x32xf32>
    %cst_54 = arith.constant 1.200000e+01 : f32
    %112 = vector.broadcast %cst_54 : f32 to vector<1x32xf32>
    %113 = arith.divf %111, %112 : vector<1x32xf32>
    %114 = vector.broadcast %113 : vector<1x32xf32> to vector<12x32xf32>
    %115 = arith.subf %107, %114 : vector<12x32xf32>
    %116 = arith.mulf %115, %115 : vector<12x32xf32>
    %cst_55 = arith.constant dense<0.000000e+00> : vector<32xf32>
    %117 = vector.multi_reduction <add>, %116, %cst_55 [0] : vector<12x32xf32> to vector<32xf32>
    %118 = vector.shape_cast %117 : vector<32xf32> to vector<1x32xf32>
    %cst_56 = arith.constant 1.200000e+01 : f32
    %119 = vector.broadcast %cst_56 : f32 to vector<1x32xf32>
    %120 = arith.divf %118, %119 : vector<1x32xf32>
    %cst_57 = arith.constant 9.99999974E-6 : f32
    %121 = vector.broadcast %cst_57 : f32 to vector<1x32xf32>
    %122 = arith.addf %120, %121 : vector<1x32xf32>
    %123 = math.rsqrt %122 : vector<1x32xf32>
    %124 = arith.mulf %108, %123 : vector<1x32xf32>
    %125 = vector.broadcast %124 : vector<1x32xf32> to vector<12x32xf32>
    %126 = arith.mulf %115, %125 : vector<12x32xf32>
    %127 = vector.broadcast %109 : vector<1x32xf32> to vector<12x32xf32>
    %128 = arith.addf %126, %127 : vector<12x32xf32>
    %cst_58 = arith.constant 0.000000e+00 : f32
    %129 = vector.broadcast %cst_58 : f32 to vector<12x32xf32>
    %130 = arith.maximumf %128, %129 : vector<12x32xf32>
    %c272 = arith.constant 272 : index
    %c0_59 = arith.constant 0 : index
    %131 = vector.load %arg2[%c272, %c0_59] : memref<304x32xbf16, #tpu.memory_space<vmem>>, vector<32x16xbf16>
    %132 = arith.truncf %130 : vector<12x32xf32> to vector<12x32xbf16>
    %cst_60 = arith.constant dense<0.000000e+00> : vector<12x16xf32>
    %133 = tpu.matmul %132, %131, %cst_60 {dimension_numbers = #tpu.dot_dimension_numbers<[1], [0], [0], [1], [0, 0, 1, 1], [], []>} : vector<12x32xbf16>, vector<32x16xbf16>, vector<12x16xf32> -> vector<12x16xf32>
    %c11 = arith.constant 11 : index
    %c0_61 = arith.constant 0 : index
    %134 = vector.load %arg3[%c11, %c0_61] : memref<16x32xf32, #tpu.memory_space<vmem>>, vector<1x16xf32>
    %135 = vector.broadcast %134 : vector<1x16xf32> to vector<12x16xf32>
    %136 = arith.addf %133, %135 : vector<12x16xf32>
    %c0_62 = arith.constant 0 : index
    %c0_63 = arith.constant 0 : index
    %137 = vector.load %arg4[%c0_62, %c0_63] : memref<12x16xf32, #tpu.memory_space<vmem>>, vector<12x16xf32>
    tpu.vector_store %arg4[%c0_62, %c0_63], %136 {strides = array<i32>} : memref<12x16xf32, #tpu.memory_space<vmem>>, vector<12x16xf32>,
    return
  }
}

</mosaic_0001>

<bundles_post_ra>
// kernel: forward.1
= control target key start
LH: loop header
LB: loop body
LE: loop exit
PB: predicated region body
PF: predicated region fallthrough
CT: control target
= control target key end

     0   :  { %vm49_vm0 = vcmask 1045504   ;;  %vm42_vm1 = vcmask 97280   ;;  %s1589_s0 = inlined_call_operand.vmem [shape: f32[12,16], index: 0, kind: input, shape index: {}]   ;;  %s1590_s1 = inlined_call_operand.vmem [shape: f32[30,16], index: 1, kind: input, shape index: {}]   ;;  %s1591_s2 = inlined_call_operand.vmem [shape: bf16[304,32], index: 2, kind: input, shape index: {}]   ;;  %s1592_s3 = inlined_call_operand.vmem [shape: f32[16,32], index: 3, kind: input, shape index: {}]   ;;  %s1593_s4 = inlined_call_operand.hbm [shape: f32[12,16], index: 4, kind: output, shape index: {0}]   ;;  %s1594_s5 = inlined_call_operand.vmem [shape: f32[30,16], index: 5, kind: output, shape index: {1}]  }
   0x1   :  { %v21_v0 = vld [vmem:[%s1589_s0] sm:$0xff]  ;;  %v22_v1 = vld [vmem:[%s1589_s0 + $0x8] sm:$0xf]  ;;  %v1318_v6 = vld [vmem:[%s1591_s2 + $0x10] sm:$0xff]  }
   0x2   :  { %v1404_v2 = vpack.c.bf16 %v22_v1, %v21_v0  ;;  %v1316_v3 = vld [vmem:[%s1591_s2] sm:$0xff]   ;;  %v1317_v4 = vld [vmem:[%s1591_s2 + $0x8] sm:$0x7f]   ;;  %v1319_v7 = vld [vmem:[%s1591_s2 + $0x18] sm:$0x7f]   ;;  %1230 = vmatprep.mubr.msk.bf16.mxu1 %vm42_vm1, %v1318_v6 }
   0x3   :  { %1224 = vmatprep.mubr.msk.bf16.mxu0 %vm42_vm1, %v1316_v3  ;;  %v1320_v8 = vld [vmem:[%s1591_s2 + $0x20] sm:$0xff]   ;;  %v1321_v9 = vld [vmem:[%s1591_s2 + $0x28] sm:$0x7f]  }
   0x4   :  { %1308 = vmatprep.subr.msk.bf16.mxu0 %vm49_vm0, %v1404_v2  ;;  %v51_v5 = vsel %vm49_vm0, %v1404_v2, 0  ;;  %1309 = vmatprep.subr.msk.bf16.mxu1 %vm49_vm0, %v1404_v2 }
   0x5   :  { %1223 = vmatpush3.bf16.msra.mxu0 %v51_v5  ;;  %1229 = vmatpush3.bf16.msra.mxu1 %v51_v5 }
   0x6   :  { %1310 = vmatprep.subr.msk.bf16.mxu0 %vm49_vm0, %v1404_v2 }
   0x8   :  { %1225 = vmatmul.mubr.msk.bf16.vlgmr.msra.gmra.mxu0 %vm42_vm1, %v1317_v4  ;;  %1231 = vmatmul.mubr.msk.bf16.vlgmr.msra.gmra.mxu1 %vm42_vm1, %v1319_v7 }
   0x9   :  { %1235 = vmatpush3.bf16.msra.mxu0 %v51_v5  ;;  %1236 = vmatprep.mubr.msk.bf16.mxu0 %vm42_vm1, %v1320_v8 }
  0x10   :  { %1237 = vmatmul.mubr.msk.bf16.vlgmr.msra.gmra.mxu0 %vm42_vm1, %v1321_v9 }
  0x11   :  { %11 = vsyncpa [#allocation3], 0  ;;  %v1322_v10 = vld [vmem:[%s1591_s2 + $0x38] sm:$0xff]   ;;  %v23_v11 = vld [vmem:[%s1590_s1] sm:$0xff]  ;;  %vm285_vm2 = vcmask 130048   ;;  %v240_v45 = vlaneseq  ;;  %vm546_vm4 = vcmask 261120  }
  0x12   :  { %1246 = vmatprep.subr.bf16.mxu0 %v1322_v10  ;;  %v24_v12 = vld [vmem:[%s1590_s1 + $0x8] sm:$0xff]  ;;  %v25_v14 = vld [vmem:[%s1590_s1 + $0x10] sm:$0xff]  ;;  %v26_v15 = vld [vmem:[%s1590_s1 + $0x18] sm:$0x3f]  ;;  %vm552_vm5 = vcmask 259072   ;;  %vm1364_vm6 = vmmov 0  }
  0x13   :  { %1247 = vmatpush3.bf16.msra.mxu0 %v1322_v10  ;;  %v273_v13 = vpack.c.bf16 %v24_v12, %v23_v11  ;;  %v274_v16 = vpack.c.bf16 %v26_v15, %v25_v14  ;;  %v1324_v17 = vld [vmem:[%s1591_s2 + $0x50] sm:$0xff]   ;;  %v1323_v18 = vld [vmem:[%s1591_s2 + $0x40] sm:$0xff]   ;;  %v1325_v19 = vld [vmem:[%s1591_s2 + $0x48] sm:$0xff]   ;;  %v1472_v49 = vshrl.u32 %v240_v45, 7  ;;  %vm828_vm7 = vcmask 128000   ;;  %s1365_s18 = smov [#allocation2]  }
  0x14   :  { %1258 = vmatprep.subr.bf16.mxu0 %v1324_v17  ;;  %1240 = vmatprep.subr.bf16.mxu1 %v1323_v18  ;;  %v1326_v38 = vld [vmem:[%s1591_s2 + $0x60] sm:$0xff]   ;;  %v1327_v39 = vld [vmem:[%s1591_s2 + $0x58] sm:$0xff]   ;;  %vm843_vm8 = vcmask 1046528   ;;  %vm839_vm9 = vcmask 244736   ;;  %vm1002_vm10 = vcmask 257024   ;;  %s1118_s19 = sshll.u32 %s1365_s18, 4  ;;  %s1119_s19 = int_to_ptr.vmem [resolvable:$true] %s1118_s19 }
  0x15   :  { %1248 = vmatprep.mubr.msk.bf16.mxu0 %vm285_vm2, %v273_v13  ;;  %1241 = vmatpush3.bf16.msra.mxu1 %v1323_v18  ;;  %v242_v55 = vadd.s32 8, %v1472_v49  ;;  %v1145_v1 = vld [vmem:[%s1592_s3] ss:$0 sm:$0xff]  ;;  %v1146_v4 = vld [vmem:[%s1592_s3 + $0x1] ss:$0 sm:$0xff]  ;;  %vm1111_vm11 = vcmask 125952   ;;  %p1346_p1 = scmp.lt.s32.totalorder %s1119_s19, %s1119_s19 }
  0x16   :  { %1252 = vmatprep.subr.bf16.mxu1 %v1325_v19  ;;  %s1341_s20 = scalar_lea.vmem %s1119_s19, 256 }
  0x17   :  { %vm246_vm3 = vcmp.lt.s32.totalorder %v242_v55, 14  ;;  %p1342_p0 = scmp.ne.s32.totalorder %s1119_s19, %s1341_s20  ;;  %p1347_p2 = scmp.lt.s32.totalorder %s1341_s20, %s1341_s20 }
  0x18   :  { %1249 = vmatmul.mubr.msk.bf16.vlgmr.msra.gmra.mxu0 %vm285_vm2, %v274_v16  ;;  %v268_v8 = vsel %vm246_vm3, %v1145_v1, %v1146_v4 }
  0x19   :  { %1259 = vmatpush3.bf16.msra.mxu0 %v1324_v17  ;;  %p1348_p3 = por %p1347_p2, %p1346_p1 }
  0x1b   :  { %p1349_p4 = pnand %p1348_p3, %p1342_p0 }
  0xc8   :  { %v1226_v20 = vpop.f32.mrf.mxu0  ;;  %v1232_v21 = vpop.f32.mrf.mxu1 }
  0xca   :  { %v87_v22 = vpop.f32.mrf.mxu0  ;;  %v156_v23 = vpop.f32.mrf.mxu1 }
  0xcc   :  { %v1227_v24 = vpop.f32.mrf.mxu0  ;;  %v1233_v25 = vpop.f32.mrf.mxu1 }
  0xcd   :  { %v474_v27 = vpack.c.bf16 %v1233_v25, %v1232_v21  ;;  %v405_v37 = vpack.c.bf16 %v1227_v24, %v1226_v20 }
  0xce   :  { %v90_v26 = vpop.f32.mrf.mxu0  ;;  %v159_v28 = vpop.f32.mrf.mxu1 }
  0xcf   :  { %v473_v30 = vpack.c.bf16 %v159_v28, %v156_v23  ;;  %v404_v36 = vpack.c.bf16 %v90_v26, %v87_v22 }
  0xd0   :  { %v1238_v29 = vpop.f32.mrf.mxu0 }
  0xd1   :  { %1260 = vmatprep.mubr.msk.bf16.mxu0 %vm285_vm2, %v473_v30 }
  0xd2   :  { %v225_v31 = vpop.f32.mrf.mxu0  ;;  %1261 = vmatmul.mubr.msk.bf16.vlgmr.msra.gmra.mxu0 %vm285_vm2, %v474_v27 }
  0xd4   :  { %v1239_v32 = vpop.f32.mrf.mxu0 }
  0xd5   :  { %v278_v35 = vpack.c.bf16 %v1239_v32, %v1238_v29 }
  0xd6   :  { %v228_v33 = vpop.f32.mrf.mxu0 }
  0xd7   :  { %v277_v34 = vpack.c.bf16 %v228_v33, %v225_v31 }
  0xd8   :  { %v1250_v40 = vpop.f32.mrf.mxu0 }
  0xd9   :  { %1242 = vmatprep.mubr.msk.bf16.mxu1 %vm285_vm2, %v277_v34 }
  0xda   :  { %1243 = vmatmul.mubr.msk.bf16.vlgmr.msra.gmra.mxu1 %vm285_vm2, %v278_v35  ;;  %v387_v41 = vpop.f32.mrf.mxu0 }
  0xdb   :  { %1253 = vmatpush3.bf16.msra.mxu1 %v1325_v19  ;;  %1254 = vmatprep.mubr.msk.bf16.mxu1 %vm285_vm2, %v404_v36 }
  0xdc   :  { %1264 = vmatprep.subr.bf16.mxu1 %v1326_v38  ;;  %v1251_v42 = vpop.f32.mrf.mxu0 }
  0xde   :  { %v390_v43 = vpop.f32.mrf.mxu0 }
  0xe2   :  { %1255 = vmatmul.mubr.msk.bf16.vlgmr.msra.gmra.mxu1 %vm285_vm2, %v405_v37 }
  0xe3   :  { %1265 = vmatpush3.bf16.msra.mxu1 %v1326_v38 }
  0xe4   :  { %1266 = vmatprep.subr.bf16.mxu1 %v1327_v39 }
  0xe7   :  { %1267 = vmatpush3.bf16.msra.mxu1 %v1327_v39 }
 0x192   :  { %v1262_v47 = vpop.f32.mrf.mxu0 }
 0x194   :  { %v521_v51 = vpop.f32.mrf.mxu0 }
 0x196   :  { %v1263_v60 = vpop.f32.mrf.mxu0 }
 0x198   :  { %v524_v7 = vpop.f32.mrf.mxu0 }
 0x19a   :  { %v1244_v44 = vpop.f32.mrf.mxu1 }
 0x19b   :  { %v396_v53 = vadd.f32 %v1250_v40, %v1244_v44 }
 0x19c   :  { %v326_v46 = vpop.f32.mrf.mxu1 }
 0x19d   :  { %v388_v54 = vadd.f32 %v387_v41, %v326_v46 }
 0x19e   :  { %v1245_v48 = vpop.f32.mrf.mxu1 }
 0x19f   :  { %v399_v57 = vadd.f32 %v1251_v42, %v1245_v48 }
 0x1a0   :  { %v329_v50 = vpop.f32.mrf.mxu1 }
 0x1a1   :  { %v391_v62 = vadd.f32 %v390_v43, %v329_v50 }
 0x1a2   :  { %v1256_v52 = vpop.f32.mrf.mxu1 }
 0x1a3   :  { %v469_v58 = vadd.f32 %v1256_v52, %v396_v53  ;;  %v544_v53 = vld [vmem:[%s1592_s3 + $0x2] sm:$0x1] }
 0x1a4   :  { %v452_v56 = vpop.f32.mrf.mxu1 }
 0x1a5   :  { %v467_v59 = vadd.f32 %v452_v56, %v388_v54  ;;  %v538_v5 = vadd.f32 %v1262_v47, %v469_v58  ;;  %v1493_v54 = vsub.s32 0, %v1472_v49  ;;  %v1159_v58 = vld [vmem:[%s1592_s3 + $0x3] ss:$0 sm:$0xff] }
 0x1a6   :  { %v1257_v61 = vpop.f32.mrf.mxu1 }
 0x1a7   :  { %v536_v63 = vadd.f32 %v521_v51, %v467_v59  ;;  %v470_v0 = vadd.f32 %v1257_v61, %v399_v57  ;;  %v542_v12 = vadd.f32 %v1146_v4, %v538_v5 }
 0x1a8   :  { %v455_v3 = vpop.f32.mrf.mxu1 }
 0x1a9   :  { %v468_v6 = vadd.f32 %v455_v3, %v391_v62  ;;  %v540_v9 = vadd.f32 %v1145_v1, %v536_v63  ;;  %v539_v10 = vadd.f32 %v1263_v60, %v470_v0  ;;  %v550_v18 = vsel %vm546_vm4, %v542_v12, 0.0 }
 0x1ab   :  { %v537_v11 = vadd.f32 %v524_v7, %v468_v6  ;;  %v547_v14 = vsel %vm546_vm4, %v540_v9, 0.0  ;;  %v543_v15 = vadd.f32 %v1146_v4, %v539_v10  ;;  %v1329_v10 = vld [vmem:[%s1591_s2 + $0x68] sm:$0xff]  }
 0x1ad   :  { %v541_v13 = vadd.f32 %v537_v11, %v268_v8  ;;  %v553_v20 = vsel %vm552_vm5, %v543_v15, 0.0 }
 0x1af   :  { %v548_v16 = vsel %vm546_vm4, %v541_v13, 0.0 }
 0x1b0   :  { %v549_v17 = vadd.f32 %v548_v16, %v547_v14 }
 0x1b2   :  { %v551_v19 = vadd.f32 %v550_v18, %v549_v17 }
 0x1b4   :  { %v554_v21 = vadd.f32 %v553_v20, %v551_v19 }
 0x1b6   :  { %v555_v22 = vrot.slane %v554_v21, 4 }
 0x1b8   :  { %v556_v23 = vadd.f32 %v555_v22, %v554_v21 }
 0x1ba   :  { %v557_v24 = vrot.slane %v556_v23, 2 }
 0x1bc   :  { %v558_v25 = vadd.f32 %v557_v24, %v556_v23 }
 0x1be   :  { %v559_v26 = vrot.slane %v558_v25, 1 }
 0x1c0   :  { %v560_v27 = vadd.f32 %v559_v26, %v558_v25 }
 0x1c2   :  { %v562_v28 = vmul.f32 0.033333335, %v560_v27 }
 0x1c4   :  { %v563_v29 = vsub.f32 %v540_v9, %v562_v28  ;;  %v564_v30 = vsub.f32 %v541_v13, %v562_v28  ;;  %v565_v31 = vsub.f32 %v542_v12, %v562_v28  ;;  %v566_v32 = vsub.f32 %v543_v15, %v562_v28  ;;  %v1328_v9 = vld [vmem:[%s1591_s2 + $0x70] sm:$0xff]   ;;  %v1160_v13 = vld [vmem:[%s1592_s3 + $0x4] ss:$0 sm:$0xff] }
 0x1c5   :  { %1272 = vmatprep.subr.bf16.mxu0 %v1328_v9 }
 0x1c6   :  { %v567_v33 = vmul.f32 %v563_v29, %v563_v29  ;;  %v568_v34 = vmul.f32 %v564_v30, %v564_v30  ;;  %v569_v35 = vmul.f32 %v565_v31, %v565_v31  ;;  %v570_v36 = vmul.f32 %v566_v32, %v566_v32  ;;  %1273 = vmatpush3.bf16.msra.mxu0 %v1328_v9 }
 0x1c7   :  { %1274 = vmatprep.subr.bf16.mxu0 %v1329_v10 }
 0x1c8   :  { %v571_v37 = vsel %vm546_vm4, %v567_v33, 0.0  ;;  %v572_v38 = vsel %vm546_vm4, %v568_v34, 0.0  ;;  %v574_v40 = vsel %vm546_vm4, %v569_v35, 0.0  ;;  %v576_v42 = vsel %vm552_vm5, %v570_v36, 0.0 }
 0x1c9   :  { %v573_v39 = vadd.f32 %v572_v38, %v571_v37 }
 0x1ca   :  { %1275 = vmatpush3.bf16.msra.mxu0 %v1329_v10 }
 0x1cb   :  { %v575_v41 = vadd.f32 %v574_v40, %v573_v39 }
 0x1cd   :  { %v577_v43 = vadd.f32 %v576_v42, %v575_v41 }
 0x1cf   :  { %v578_v44 = vrot.slane %v577_v43, 4 }
 0x1d1   :  { %v579_v45 = vadd.f32 %v578_v44, %v577_v43 }
 0x1d3   :  { %v580_v46 = vrot.slane %v579_v45, 2 }
 0x1d5   :  { %v581_v47 = vadd.f32 %v580_v46, %v579_v45 }
 0x1d7   :  { %v582_v48 = vrot.slane %v581_v47, 1 }
 0x1d9   :  { %v583_v50 = vadd.f32 %v582_v48, %v581_v47 }
 0x1db   :  { %v584_v51 = vmul.f32 0.033333335, %v583_v50 }
 0x1dd   :  { %v585_v52 = vadd.f32 1e-05, %v584_v51 }
 0x1df   :  { %1335 = vrsqrt.f32 %v585_v52 }
 0x1ec   :  { %v1336_v55 = vpop.eup %1335 }
 0x1ed   :  { %v587_v56 = vmul.f32 %v1336_v55, %v544_v53 }
 0x1ef   :  { %v591_v57 = vrot.slane %v587_v56, %v1493_v54 }
 0x1f1   :  { %v593_v59 = vmul.f32 %v591_v57, %v564_v30  ;;  %v592_v60 = vmul.f32 %v591_v57, %v563_v29  ;;  %v594_v61 = vmul.f32 %v591_v57, %v565_v31  ;;  %v595_v62 = vmul.f32 %v591_v57, %v566_v32 }
 0x1f3   :  { %v600_v63 = vadd.f32 %v1159_v58, %v592_v60  ;;  %v601_v0 = vadd.f32 %v1159_v58, %v593_v59  ;;  %v602_v1 = vadd.f32 %v1159_v58, %v594_v61  ;;  %v603_v3 = vadd.f32 %v1159_v58, %v595_v62  ;;  %v686_v59 = vld [vmem:[%s1592_s3 + $0x5] sm:$0x1] }
 0x1f5   :  { %v604_v4 = vmax.f32 %v600_v63, 0.0  ;;  %v605_v5 = vmax.f32 %v601_v0, 0.0  ;;  %v606_v49 = vmax.f32 %v602_v1, 0.0  ;;  %v607_v6 = vmax.f32 %v603_v3, 0.0  ;;  %v1165_v63 = vld [vmem:[%s1592_s3 + $0x6] ss:$0 sm:$0xff] }
 0x1f7   :  { %v612_v7 = vpack.c.bf16 %v605_v5, %v604_v4  ;;  %v613_v8 = vpack.c.bf16 %v607_v6, %v606_v49 }
 0x1f9   :  { %1268 = vmatprep.mubr.msk.bf16.mxu1 %vm546_vm4, %v612_v7 }
 0x1fa   :  { %1269 = vmatmul.mubr.msk.bf16.vlgmr.msra.gmra.mxu1 %vm546_vm4, %v613_v8 }
 0x2ba   :  { %v1270_v11 = vpop.f32.mrf.mxu1 }
 0x2bb   :  { %v680_v17 = vadd.f32 %v1270_v11, %v1160_v13 }
 0x2bc   :  { %v671_v12 = vpop.f32.mrf.mxu1 }
 0x2bd   :  { %v672_v15 = vadd.f32 %v1160_v13, %v671_v12  ;;  %v691_v23 = vsel %vm546_vm4, %v680_v17, 0.0 }
 0x2be   :  { %v1271_v14 = vpop.f32.mrf.mxu1 }
 0x2bf   :  { %v688_v19 = vsel %vm546_vm4, %v672_v15, 0.0  ;;  %v683_v20 = vadd.f32 %v1271_v14, %v1160_v13  ;;  %v1363_v14 = vmov 0.0  }
 0x2c0   :  { %v674_v16 = vpop.f32.mrf.mxu1  ;;  %1280 = vmatprep.subr.bf16.mxu1 %v1363_v14  ;;  %1288 = vmatprep.subr.bf16.mxu0 %v1363_v14 }
 0x2c1   :  { %v675_v18 = vadd.f32 %v1160_v13, %v674_v16  ;;  %v693_v25 = vsel %vm552_vm5, %v683_v20, 0.0  ;;  %1284 = vmatprep.mubr.msk.bf16.mxu1 %vm1364_vm6, %v1363_v14 }
 0x2c3   :  { %v689_v21 = vsel %vm546_vm4, %v675_v18, 0.0 }
 0x2c4   :  { %v690_v22 = vadd.f32 %v689_v21, %v688_v19 }
 0x2c6   :  { %v692_v24 = vadd.f32 %v691_v23, %v690_v22 }
 0x2c8   :  { %v694_v26 = vadd.f32 %v693_v25, %v692_v24 }
 0x2ca   :  { %v695_v27 = vrot.slane %v694_v26, 4 }
 0x2cc   :  { %v696_v28 = vadd.f32 %v695_v27, %v694_v26  ;;  %v1330_v27 = vld [vmem:[%s1591_s2 + $0x30] sm:$0x3f]  }
 0x2ce   :  { %v697_v29 = vrot.slane %v696_v28, 2 }
 0x2d0   :  { %v698_v30 = vadd.f32 %v697_v29, %v696_v28  ;;  %v1331_v28 = vld [vmem:[%s1591_s2 + $0x78] sm:$0xff]   ;;  %v1332_v29 = vld [vmem:[%s1591_s2 + $0x80] sm:$0xff]  }
 0x2d2   :  { %v699_v31 = vrot.slane %v698_v30, 1 }
 0x2d4   :  { %v700_v32 = vadd.f32 %v699_v31, %v698_v30 }
 0x2d6   :  { %v701_v33 = vmul.f32 0.033333335, %v700_v32 }
 0x2d8   :  { %v702_v34 = vsub.f32 %v672_v15, %v701_v33  ;;  %v703_v35 = vsub.f32 %v675_v18, %v701_v33  ;;  %v704_v36 = vsub.f32 %v680_v17, %v701_v33  ;;  %v705_v37 = vsub.f32 %v683_v20, %v701_v33  ;;  %v1166_v15 = vld [vmem:[%s1592_s3 + $0x7] ss:$0 sm:$0xff] }
 0x2da   :  { %v706_v38 = vmul.f32 %v702_v34, %v702_v34  ;;  %v707_v39 = vmul.f32 %v703_v35, %v703_v35  ;;  %v708_v40 = vmul.f32 %v704_v36, %v704_v36  ;;  %v709_v41 = vmul.f32 %v705_v37, %v705_v37 }
 0x2dc   :  { %v710_v42 = vsel %vm546_vm4, %v706_v38, 0.0  ;;  %v711_v43 = vsel %vm546_vm4, %v707_v39, 0.0  ;;  %v713_v45 = vsel %vm546_vm4, %v708_v40, 0.0  ;;  %v715_v47 = vsel %vm552_vm5, %v709_v41, 0.0  ;;  %v1334_v39 = vld [vmem:[%s1591_s2 + $0x88] sm:$0xff]  }
 0x2dd   :  { %v712_v44 = vadd.f32 %v711_v43, %v710_v42  ;;  %v1177_v42 = vld [vmem:[%s1592_s3 + $0x8] ss:$0 sm:$0xff] }
 0x2df   :  { %v714_v46 = vadd.f32 %v713_v45, %v712_v44 }
 0x2e1   :  { %v716_v48 = vadd.f32 %v715_v47, %v714_v46 }
 0x2e3   :  { %v717_v50 = vrot.slane %v716_v48, 4 }
 0x2e5   :  { %v718_v51 = vadd.f32 %v717_v50, %v716_v48 }
 0x2e7   :  { %v719_v52 = vrot.slane %v718_v51, 2 }
 0x2e9   :  { %v720_v53 = vadd.f32 %v719_v52, %v718_v51 }
 0x2eb   :  { %v721_v55 = vrot.slane %v720_v53, 1 }
 0x2ed   :  { %v722_v56 = vadd.f32 %v721_v55, %v720_v53 }
 0x2ef   :  { %v723_v57 = vmul.f32 0.033333335, %v722_v56 }
 0x2f1   :  { %v724_v58 = vadd.f32 1e-05, %v723_v57 }
 0x2f3   :  { %1337 = vrsqrt.f32 %v724_v58 }
 0x300   :  { %v1338_v60 = vpop.eup %1337 }
 0x301   :  { %v726_v61 = vmul.f32 %v1338_v60, %v686_v59 }
 0x303   :  { %v730_v62 = vrot.slane %v726_v61, %v1493_v54 }
 0x305   :  { %v732_v0 = vmul.f32 %v730_v62, %v703_v35  ;;  %v731_v1 = vmul.f32 %v730_v62, %v702_v34  ;;  %v733_v3 = vmul.f32 %v730_v62, %v704_v36  ;;  %v734_v4 = vmul.f32 %v730_v62, %v705_v37 }
 0x307   :  { %v740_v5 = vadd.f32 %v1165_v63, %v732_v0  ;;  %v739_v49 = vadd.f32 %v1165_v63, %v731_v1  ;;  %v741_v6 = vadd.f32 %v1165_v63, %v733_v3  ;;  %v742_v7 = vadd.f32 %v1165_v63, %v734_v4 }
 0x309   :  { %v744_v8 = vmax.f32 %v740_v5, 0.0  ;;  %v743_v9 = vmax.f32 %v739_v49, 0.0  ;;  %v745_v10 = vmax.f32 %v741_v6, 0.0  ;;  %v746_v11 = vmax.f32 %v742_v7, 0.0 }
 0x30b   :  { %v751_v12 = vpack.c.bf16 %v744_v8, %v743_v9  ;;  %v752_v13 = vpack.c.bf16 %v746_v11, %v745_v10 }
 0x30d   :  { %1276 = vmatprep.mubr.msk.bf16.mxu0 %vm546_vm4, %v751_v12  ;;  %v999_v12 = vld [vmem:[%s1592_s3 + $0x9] sm:$0x1] }
 0x30e   :  { %1277 = vmatmul.mubr.msk.bf16.vlgmr.msra.gmra.mxu0 %vm546_vm4, %v752_v13 }
 0x30f   :  { %1290 = vmatprep.mubr.msk.bf16.mxu0 %vm1364_vm6, %v1363_v14  ;;  %1289 = vmatpush3.bf16.msra.mxu0 %v1332_v29 }
 0x310   :  { %1300 = vmatprep.subr.bf16.mxu0 %v1363_v14 }
 0x3ce   :  { %v1278_v16 = vpop.f32.mrf.mxu0 }
 0x3cf   :  { %v819_v17 = vadd.f32 %v1278_v16, %v1166_v15  ;;  %v1178_v16 = vld [vmem:[%s1592_s3 + $0xa] ss:$0 sm:$0xff] }
 0x3d0   :  { %v810_v18 = vpop.f32.mrf.mxu0 }
 0x3d1   :  { %827 = vst.msk [vmem:[%s1594_s5 + $0x10] sm:$0xff] %vm285_vm2, %v819_v17  ;;  %v811_v19 = vadd.f32 %v1166_v15, %v810_v18 }
 0x3d2   :  { %v1279_v20 = vpop.f32.mrf.mxu0 }
 0x3d3   :  { %825 = vst.msk [vmem:[%s1594_s5] sm:$0xff] %vm285_vm2, %v811_v19  ;;  %v822_v21 = vadd.f32 %v1279_v20, %v1166_v15 }
 0x3d4   :  { %v813_v22 = vpop.f32.mrf.mxu0 }
 0x3d5   :  { %829 = vst.msk [vmem:[%s1594_s5 + $0x18] sm:$0x3f] %vm828_vm7, %v822_v21  ;;  %v833_v23 = vpack.c.bf16 %v822_v21, %v819_v17  ;;  %v814_v24 = vadd.f32 %v1166_v15, %v813_v22 }
 0x3d7   :  { %826 = vst.msk [vmem:[%s1594_s5 + $0x8] sm:$0xff] %vm285_vm2, %v814_v24  ;;  %v845_v25 = vsel %vm843_vm8, %v833_v23, 0  ;;  %v832_v26 = vpack.c.bf16 %v814_v24, %v811_v19  ;;  %v1179_v24 = vld [vmem:[%s1592_s3 + $0xb] ss:$0 sm:$0xff] }
 0x3d8   :  { %1281 = vmatpush3.bf16.msra.mxu1 %v845_v25 }
 0x3d9   :  { %1282 = vmatprep.subr.bf16.mxu1 %v1363_v14 }
 0x3dc   :  { %1283 = vmatpush3.bf16.msra.mxu1 %v832_v26 }
 0x3dd   :  { %1294 = vmatprep.subr.bf16.mxu1 %v1363_v14 }
 0x3df   :  { %1285 = vmatmul.mubr.msk.bf16.vlgmr.msra.gmra.mxu1 %vm839_vm9, %v1330_v27 }
 0x3e0   :  { %1295 = vmatpush3.bf16.msra.mxu1 %v1331_v28  ;;  %1296 = vmatprep.mubr.msk.bf16.mxu1 %vm1364_vm6, %v1363_v14 }
 0x3e7   :  { %1297 = vmatmul.mubr.msk.bf16.vlgmr.msra.gmra.mxu1 %vm285_vm2, %v1404_v2  ;;  %v1333_v2 = vld [vmem:[%s1591_s2 + $0x90] sm:$0xff]  }
 0x49f   :  { %v881_v30 = vpop.f32.mrf.mxu1 }
 0x4a1   :  { %v1286_v31 = vpop.f32.mrf.mxu1 }
 0x4a3   :  { %v884_v32 = vpop.f32.mrf.mxu1 }
 0x4a4   :  { %v892_v33 = vpack.c.bf16 %v884_v32, %v881_v30 }
 0x4a5   :  { %v1287_v34 = vpop.f32.mrf.mxu1 }
 0x4a6   :  { %1291 = vmatmul.mubr.msk.bf16.vlgmr.msra.gmra.mxu0 %vm285_vm2, %v892_v33 }
 0x4a7   :  { %v985_v35 = vpop.f32.mrf.mxu1  ;;  %1304 = vmatprep.mubr.msk.bf16.mxu0 %vm1364_vm6, %v1363_v14  ;;  %1301 = vmatpush3.bf16.msra.mxu0 %v1333_v2 }
 0x4a8   :  { %1302 = vmatprep.subr.bf16.mxu0 %v1363_v14 }
 0x4a9   :  { %v1298_v36 = vpop.f32.mrf.mxu1 }
 0x4ab   :  { %v988_v37 = vpop.f32.mrf.mxu1  ;;  %1303 = vmatpush3.bf16.msra.mxu0 %v1334_v39 }
 0x4ad   :  { %v1299_v38 = vpop.f32.mrf.mxu1 }
 0x566   :  { %v936_v40 = vpop.f32.mrf.mxu0 }
 0x567   :  { %v986_v41 = vadd.f32 %v985_v35, %v936_v40 }
 0x568   :  { %v1292_v43 = vpop.f32.mrf.mxu0 }
 0x569   :  { %v997_v45 = vadd.f32 %v1177_v42, %v986_v41 }
 0x56a   :  { %v939_v44 = vpop.f32.mrf.mxu0 }
 0x56b   :  { %v989_v46 = vadd.f32 %v988_v37, %v939_v44  ;;  %v1001_v50 = vsel %vm546_vm4, %v997_v45, 0.0 }
 0x56c   :  { %v1293_v47 = vpop.f32.mrf.mxu0 }
 0x56d   :  { %v998_v48 = vadd.f32 %v1177_v42, %v989_v46 }
 0x56f   :  { %v1003_v51 = vsel %vm1002_vm10, %v998_v48, 0.0 }
 0x570   :  { %v1004_v52 = vadd.f32 %v1003_v51, %v1001_v50 }
 0x572   :  { %v1005_v53 = vrot.slane %v1004_v52, 4 }
 0x574   :  { %v1006_v55 = vadd.f32 %v1005_v53, %v1004_v52 }
 0x576   :  { %v1007_v56 = vrot.slane %v1006_v55, 2 }
 0x578   :  { %v1008_v57 = vadd.f32 %v1007_v56, %v1006_v55 }
 0x57a   :  { %v1009_v58 = vrot.slane %v1008_v57, 1 }
 0x57c   :  { %v1010_v59 = vadd.f32 %v1009_v58, %v1008_v57 }
 0x57e   :  { %v1012_v60 = vmul.f32 0.083333336, %v1010_v59 }
 0x580   :  { %v1013_v61 = vsub.f32 %v997_v45, %v1012_v60  ;;  %v1014_v62 = vsub.f32 %v998_v48, %v1012_v60 }
 0x582   :  { %v1015_v63 = vmul.f32 %v1013_v61, %v1013_v61  ;;  %v1016_v0 = vmul.f32 %v1014_v62, %v1014_v62 }
 0x584   :  { %v1017_v1 = vsel %vm546_vm4, %v1015_v63, 0.0  ;;  %v1018_v3 = vsel %vm1002_vm10, %v1016_v0, 0.0 }
 0x585   :  { %v1019_v4 = vadd.f32 %v1018_v3, %v1017_v1 }
 0x587   :  { %v1020_v5 = vrot.slane %v1019_v4, 4 }
 0x589   :  { %v1021_v49 = vadd.f32 %v1020_v5, %v1019_v4 }
 0x58b   :  { %v1022_v6 = vrot.slane %v1021_v49, 2 }
 0x58d   :  { %v1023_v7 = vadd.f32 %v1022_v6, %v1021_v49 }
 0x58f   :  { %v1024_v8 = vrot.slane %v1023_v7, 1 }
 0x591   :  { %v1025_v9 = vadd.f32 %v1024_v8, %v1023_v7 }
 0x593   :  { %v1026_v10 = vmul.f32 0.083333336, %v1025_v9 }
 0x595   :  { %v1027_v11 = vadd.f32 1e-05, %v1026_v10 }
 0x597   :  { %1339 = vrsqrt.f32 %v1027_v11 }
 0x5a4   :  { %v1340_v13 = vpop.eup %1339 }
 0x5a5   :  { %v1029_v14 = vmul.f32 %v1340_v13, %v999_v12 }
 0x5a7   :  { %v1033_v15 = vrot.slane %v1029_v14, %v1493_v54 }
 0x5a9   :  { %v1034_v17 = vmul.f32 %v1033_v15, %v1013_v61  ;;  %v1035_v18 = vmul.f32 %v1033_v15, %v1014_v62 }
 0x5ab   :  { %v1040_v19 = vadd.f32 %v1178_v16, %v1034_v17  ;;  %v1041_v20 = vadd.f32 %v1178_v16, %v1035_v18 }
 0x5ad   :  { %v1042_v21 = vmax.f32 %v1040_v19, 0.0  ;;  %v1043_v22 = vmax.f32 %v1041_v20, 0.0 }
 0x5af   :  { %v1048_v23 = vpack.c.bf16 %v1043_v22, %v1042_v21 }
 0x5b1   :  { %1305 = vmatmul.mubr.msk.bf16.vlgmr.msra.gmra.mxu0 %vm546_vm4, %v1048_v23 }
 0x671   :  { %v1103_v25 = vpop.f32.mrf.mxu0 }
 0x672   :  { %v1104_v26 = vadd.f32 %v1179_v24, %v1103_v25 }
 0x673   :  { %v1306_v54 = vpop.f32.mrf.mxu0 }
 0x674   :  { %1110 = vst.msk [vmem:[#allocation2] sm:$0xff] %vm285_vm2, %v1104_v26 }
 0x675   :  { %v1106_v27 = vpop.f32.mrf.mxu0 }
 0x676   :  { %v1107_v28 = vadd.f32 %v1179_v24, %v1106_v27 }
 0x677   :  { %v1307_v29 = vpop.f32.mrf.mxu0 }
 0x678   :  { %1112 = vst.msk [vmem:[#allocation2 + $0x8] sm:$0xf] %vm1111_vm11, %v1107_v28 }
 0x679   :  { %1352 = shalt.err (!%p1349_p4)
}
 0x67a   :  { %s1366_s3 = smov 128   ;;  %s1367_s21 = smov 8  }
 0x67b   :  { %1124 = dma.vmem_to_hbm [thread:$0]  %s1119_s19, 256, %s1593_s4, [#allocation3], %s1366_s3, %s1366_s3, %s1367_s21  }
 0x67c   :  { %1361 = dma.done.wait [#allocation3], 256  }
 0x67d   :  { %1362 = vsyncadd [#allocation3], 4294967040 }
 0x67e   :  { %1132 = vsyncpa [#allocation3], 1 }

</bundles_post_ra>
